<compile_context>
chip_gen: v5e
topology: v5e:2x2
jax: 0.10.0
libtpu: 0.0.40
codegen_flags: <defaults>
</compile_context>

<pallas_src>
import functools

import jax
import jax.numpy as jnp
from jax import lax
from jax.experimental import pallas as pl
from jax.experimental.pallas import tpu as pltpu

H1, H2, H3 = 16, 64, 16   # hidden widths fixed by the PyTorch module
CHUNK = 256               # inner lane-chunk width (multiple of 128)


def _mlp_kernel(x_ref, w1_ref, w2_ref, w3_ref, w4_ref, b_ref, o_ref,
                *, n_output, chunk):
    tile_b = x_ref.shape[0]
    n_chunks = tile_b // chunk

    # Hoisted once per grid step (loop-invariant): resident weights and
    # pre-broadcast biases.  Broadcasting inside the chunk loop would re-emit
    # broadcast_in_dim every iteration.
    w1 = w1_ref[...]                                    # (16, n_input)   f32
    w2 = w2_ref[...]                                    # (64, 16)
    w3 = w3_ref[...]                                    # (16, 64)
    w4 = w4_ref[...]                                    # (n_output, 16)
    b1 = jnp.broadcast_to(b_ref[0:H1, 0:1], (H1, chunk))
    b2 = jnp.broadcast_to(b_ref[0:H2, 1:2], (H2, chunk))
    b3 = jnp.broadcast_to(b_ref[0:H3, 2:3], (H3, chunk))
    b4 = jnp.broadcast_to(b_ref[0:n_output, 3:4], (n_output, chunk))

    # Contract the last axis of both operands: (16, n_in) x (chunk, n_in)^T.
    dn_t = (((1,), (1,)), ((), ()))

    def compute_chunk(start):
        xc = x_ref[pl.ds(start, chunk), :]              # (chunk, n_input) f32
        h = lax.dot_general(w1, xc, dn_t,
                            preferred_element_type=jnp.float32) + b1
        h = jnp.maximum(h, 0.0)                         # (16, chunk)
        h = jnp.dot(w2, h, preferred_element_type=jnp.float32) + b2
        h = jnp.maximum(h, 0.0)                         # (64, chunk)
        h = jnp.dot(w3, h, preferred_element_type=jnp.float32) + b3
        h = jnp.maximum(h, 0.0)                         # (16, chunk)
        y = jnp.dot(w4, h, preferred_element_type=jnp.float32) + b4
        # Lane-dense store: chunk is a multiple of 128 -> unmasked vst.
        o_ref[:, pl.ds(start, chunk)] = y.astype(o_ref.dtype)

    if n_chunks == 1:
        compute_chunk(0)
    else:
        def body(c, carry):
            compute_chunk(pl.multiple_of(c * chunk, chunk))
            return carry
        lax.fori_loop(0, n_chunks, body, 0)


def _pick_tile_b(B, chunk, max_tile_b, min_grid_steps):
    """Largest tile that (a) is a multiple of `chunk`, (b) is <= max_tile_b,
    and (c) keeps >= min_grid_steps grid steps when B is big enough, so the
    'parallel' batch axis can megacore-shard on v7x and padding waste is
    bounded."""
    target = pl.cdiv(B, min_grid_steps)
    tile_b = pl.cdiv(target, chunk) * chunk
    return max(chunk, min(max_tile_b, tile_b))


def ac_disp_net(x, params, *, max_tile_b=8192, chunk=CHUNK,
                min_grid_steps=2, x_buffers=2, lane_major_out=False):
    """x: (B, n_input) float32.  params: PyTorch-layout weights
    w_i (fan_out, fan_in) and biases b_i (fan_out,).

    lane_major_out=True returns the kernel's native lane-dense (n_output, B)
    layout (preferred: no extra HBM transpose pass); False returns the
    PyTorch (B, n_output) layout for drop-in parity.
    """
    B, n_input = x.shape
    n_output = params["w4"].shape[0]

    chunk = max(128, (int(chunk) // 128) * 128)
    tile_b = _pick_tile_b(B, chunk, int(max_tile_b), int(min_grid_steps))
    B_pad = pl.cdiv(B, tile_b) * tile_b
    grid = (B_pad // tile_b,)

    # Remainder handling only: zero-pad the batch to a tile multiple.  The
    # padded rows produce garbage (bias + ReLU) but are sliced off below.
    x_pad = x if B_pad == B else jnp.pad(x, ((0, B_pad - B), (0, 0)))

    w1 = params["w1"].astype(jnp.float32)               # (16, n_input)
    w2 = params["w2"].astype(jnp.float32)               # (64, 16)
    w3 = params["w3"].astype(jnp.float32)               # (16, 64)
    w4 = params["w4"].astype(jnp.float32)               # (n_output, 16)

    # Pack the four biases into one (max(H2, n_output), 4) f32 slab
    # (column j holds the bias of layer j+1).
    rows = max(H2, n_output)
    b_packed = jnp.zeros((rows, 4), jnp.float32)
    for j, name in enumerate(("b1", "b2", "b3", "b4")):
        b = params[name].reshape(-1).astype(jnp.float32)
        b_packed = b_packed.at[: b.shape[0], j].set(b)

    def full(shape):
        return pl.BlockSpec(shape, lambda i: (0, 0))

    x_spec_kwargs = {}
    if x_buffers != 2:   # e.g. 3 on v5e if the x DMA is still exposed
        x_spec_kwargs["pipeline_mode"] = pl.Buffered(int(x_buffers))
    x_spec = pl.BlockSpec((tile_b, n_input), lambda i: (i, 0), **x_spec_kwargs)

    grid_spec = pltpu.PrefetchScalarGridSpec(
        num_scalar_prefetch=0,
        grid=grid,
        in_specs=[x_spec,
                  full(w1.shape), full(w2.shape),
                  full(w3.shape), full(w4.shape),
                  full(b_packed.shape)],
        out_specs=pl.BlockSpec((n_output, tile_b), lambda i: (0, i)),
    )

    flops = 2 * B_pad * (n_input * H1 + H1 * H2 + H2 * H3 + H3 * n_output)
    bytes_accessed = (x_pad.size * 4                    # f32 activations in
                      + n_output * B_pad * 4            # f32 output
                      + (w1.size + w2.size + w3.size + w4.size) * 4
                      + b_packed.size * 4)

    y_tn = pl.pallas_call(
        functools.partial(_mlp_kernel, n_output=n_output, chunk=chunk),
        out_shape=jax.ShapeDtypeStruct((n_output, B_pad), x.dtype),
        grid_spec=grid_spec,
        compiler_params=pltpu.CompilerParams(
            dimension_semantics=("parallel",)),          # megacore on v7x
        cost_estimate=pl.CostEstimate(
            flops=flops, transcendentals=0, bytes_accessed=bytes_accessed),
    )(x_pad, w1, w2, w3, w4, b_packed)

    if lane_major_out:
        return y_tn[:, :B]       # (n_output, B) lane-dense, no transpose pass
    return y_tn[:, :B].T         # (B, n_output) PyTorch layout parity


def init_params(key, n_input, n_output):
    """Deterministic PyTorch-style Linear init, native (fan_out, fan_in) layout."""
    dims = [(n_input, H1), (H1, H2), (H2, H3), (H3, n_output)]
    params = {}
    keys = jax.random.split(key, 2 * len(dims))
    for idx, (fan_in, fan_out) in enumerate(dims):
        bound = 1.0 / jnp.sqrt(jnp.float32(fan_in))
        w = jax.random.uniform(keys[2 * idx], (fan_out, fan_in),
                               minval=-bound, maxval=bound, dtype=jnp.float32)
        b = jax.random.uniform(keys[2 * idx + 1], (fan_out,),
                               minval=-bound, maxval=bound, dtype=jnp.float32)
        params[f"w{idx + 1}"] = w
        params[f"b{idx + 1}"] = b
    return params


def reference(x, params):
    """Pure-JAX f32 reference matching the PyTorch forward (y = x @ W.T + b)."""
    h = x
    for i in (1, 2, 3):
        h = jnp.maximum(
            jnp.dot(h, params[f"w{i}"].T, precision=lax.Precision.HIGHEST)
            + params[f"b{i}"], 0.0)
    return (jnp.dot(h, params["w4"].T, precision=lax.Precision.HIGHEST)
            + params["b4"])


if __name__ == "__main__":
    key = jax.random.PRNGKey(0)
    n_input, n_output, batch = 8, 4, 16

    k_x, k_p = jax.random.split(key)
    x = jax.random.normal(k_x, (batch, n_input), dtype=jnp.float32)
    params = init_params(k_p, n_input, n_output)

    # Preferred consumption: lane-dense (n_output, B) output, no wrapper
    # transpose pass over the result.
    out_nb = ac_disp_net(x, params, lane_major_out=True)
    out_nb = jax.block_until_ready(out_nb)

    ref = reference(x, params)
    assert out_nb.shape == (n_output, batch)
    err = jnp.max(jnp.abs(out_nb.T - ref))
    # All-f32 resident compute -> much tighter tolerance than the old bf16 path.
    assert jnp.allclose(out_nb.T, ref, atol=1e-2, rtol=1e-2), (
        f"max abs err {err}")

    # PyTorch-layout parity path also works.
    out_bn = jax.block_until_ready(ac_disp_net(x, params))
    assert out_bn.shape == (batch, n_output)
    assert jnp.allclose(out_bn, ref, atol=1e-2, rtol=1e-2)

    print("KERNEL_OK")
</pallas_src>

<mosaic_0001>
module attributes {stable_mosaic.version = 11 : i64} {
  func.func @_mlp_kernel(%arg0: i32, %arg1: memref<256x8xf32, #tpu.memory_space<vmem>>, %arg2: memref<16x8xf32, #tpu.memory_space<vmem>>, %arg3: memref<64x16xf32, #tpu.memory_space<vmem>>, %arg4: memref<16x64xf32, #tpu.memory_space<vmem>>, %arg5: memref<4x16xf32, #tpu.memory_space<vmem>>, %arg6: memref<64x4xf32, #tpu.memory_space<vmem>>, %arg7: memref<4x256xf32, #tpu.memory_space<vmem>>) attributes {dimension_semantics = [#tpu.dimension_semantics<parallel>], iteration_bounds = array<i64: 1>, scalar_prefetch = 0 : i64, scratch_operands = 0 : i64, tpu.core_type = #tpu.core_type<tc>, window_params = [{transform_indices = @transform_0, window_bounds = array<i64: 256, 8>}, {pipeline_mode = #tpu.pipeline_mode<synchronous>, transform_indices = @transform_1, window_bounds = array<i64: 16, 8>}, {pipeline_mode = #tpu.pipeline_mode<synchronous>, transform_indices = @transform_2, window_bounds = array<i64: 64, 16>}, {pipeline_mode = #tpu.pipeline_mode<synchronous>, transform_indices = @transform_3, window_bounds = array<i64: 16, 64>}, {pipeline_mode = #tpu.pipeline_mode<synchronous>, transform_indices = @transform_4, window_bounds = array<i64: 4, 16>}, {pipeline_mode = #tpu.pipeline_mode<synchronous>, transform_indices = @transform_5, window_bounds = array<i64: 64, 4>}, {transform_indices = @transform_6, window_bounds = array<i64: 4, 256>}]} {
    %c0 = arith.constant 0 : index
    %c0_0 = arith.constant 0 : index
    %0 = vector.load %arg2[%c0, %c0_0] : memref<16x8xf32, #tpu.memory_space<vmem>>, vector<16x8xf32>
    %c0_1 = arith.constant 0 : index
    %c0_2 = arith.constant 0 : index
    %1 = vector.load %arg3[%c0_1, %c0_2] : memref<64x16xf32, #tpu.memory_space<vmem>>, vector<64x16xf32>
    %c0_3 = arith.constant 0 : index
    %c0_4 = arith.constant 0 : index
    %2 = vector.load %arg4[%c0_3, %c0_4] : memref<16x64xf32, #tpu.memory_space<vmem>>, vector<16x64xf32>
    %c0_5 = arith.constant 0 : index
    %c0_6 = arith.constant 0 : index
    %3 = vector.load %arg5[%c0_5, %c0_6] : memref<4x16xf32, #tpu.memory_space<vmem>>, vector<4x16xf32>
    %c0_7 = arith.constant 0 : index
    %c0_8 = arith.constant 0 : index
    %4 = vector.load %arg6[%c0_7, %c0_8] : memref<64x4xf32, #tpu.memory_space<vmem>>, vector<16x1xf32>
    %5 = vector.shape_cast %4 : vector<16x1xf32> to vector<16x1xf32>
    %6 = vector.broadcast %5 : vector<16x1xf32> to vector<16x256xf32>
    %c0_9 = arith.constant 0 : index
    %c1 = arith.constant 1 : index
    %7 = vector.load %arg6[%c0_9, %c1] : memref<64x4xf32, #tpu.memory_space<vmem>>, vector<64x1xf32>
    %8 = vector.shape_cast %7 : vector<64x1xf32> to vector<64x1xf32>
    %9 = vector.broadcast %8 : vector<64x1xf32> to vector<64x256xf32>
    %c0_10 = arith.constant 0 : index
    %c2 = arith.constant 2 : index
    %10 = vector.load %arg6[%c0_10, %c2] : memref<64x4xf32, #tpu.memory_space<vmem>>, vector<16x1xf32>
    %11 = vector.shape_cast %10 : vector<16x1xf32> to vector<16x1xf32>
    %12 = vector.broadcast %11 : vector<16x1xf32> to vector<16x256xf32>
    %c0_11 = arith.constant 0 : index
    %c3 = arith.constant 3 : index
    %13 = vector.load %arg6[%c0_11, %c3] : memref<64x4xf32, #tpu.memory_space<vmem>>, vector<4x1xf32>
    %14 = vector.shape_cast %13 : vector<4x1xf32> to vector<4x1xf32>
    %15 = vector.broadcast %14 : vector<4x1xf32> to vector<4x256xf32>
    %c0_12 = arith.constant 0 : index
    %c0_13 = arith.constant 0 : index
    %16 = vector.load %arg1[%c0_12, %c0_13] : memref<256x8xf32, #tpu.memory_space<vmem>>, vector<256x8xf32>
    %cst = arith.constant dense<0.000000e+00> : vector<16x256xf32>
    %17 = tpu.matmul %0, %16, %cst {dimension_numbers = #tpu.dot_dimension_numbers<[1], [1], [0], [0], [0, 0, 1, 0], [], []>} : vector<16x8xf32>, vector<256x8xf32>, vector<16x256xf32> -> vector<16x256xf32>
    %18 = arith.addf %17, %6 : vector<16x256xf32>
    %cst_14 = arith.constant 0.000000e+00 : f32
    %19 = vector.broadcast %cst_14 : f32 to vector<16x256xf32>
    %20 = arith.maximumf %18, %19 : vector<16x256xf32>
    %cst_15 = arith.constant dense<0.000000e+00> : vector<64x256xf32>
    %21 = tpu.matmul %1, %20, %cst_15 {dimension_numbers = #tpu.dot_dimension_numbers<[1], [0], [0], [1], [0, 0, 1, 1], [], []>} : vector<64x16xf32>, vector<16x256xf32>, vector<64x256xf32> -> vector<64x256xf32>
    %22 = arith.addf %21, %9 : vector<64x256xf32>
    %cst_16 = arith.constant 0.000000e+00 : f32
    %23 = vector.broadcast %cst_16 : f32 to vector<64x256xf32>
    %24 = arith.maximumf %22, %23 : vector<64x256xf32>
    %cst_17 = arith.constant dense<0.000000e+00> : vector<16x256xf32>
    %25 = tpu.matmul %2, %24, %cst_17 {dimension_numbers = #tpu.dot_dimension_numbers<[1], [0], [0], [1], [0, 0, 1, 1], [], []>} : vector<16x64xf32>, vector<64x256xf32>, vector<16x256xf32> -> vector<16x256xf32>
    %26 = arith.addf %25, %12 : vector<16x256xf32>
    %cst_18 = arith.constant 0.000000e+00 : f32
    %27 = vector.broadcast %cst_18 : f32 to vector<16x256xf32>
    %28 = arith.maximumf %26, %27 : vector<16x256xf32>
    %cst_19 = arith.constant dense<0.000000e+00> : vector<4x256xf32>
    %29 = tpu.matmul %3, %28, %cst_19 {dimension_numbers = #tpu.dot_dimension_numbers<[1], [0], [0], [1], [0, 0, 1, 1], [], []>} : vector<4x16xf32>, vector<16x256xf32>, vector<4x256xf32> -> vector<4x256xf32>
    %30 = arith.addf %29, %15 : vector<4x256xf32>
    %c0_20 = arith.constant 0 : index
    %c0_21 = arith.constant 0 : index
    %31 = vector.load %arg7[%c0_20, %c0_21] : memref<4x256xf32, #tpu.memory_space<vmem>>, vector<4x256xf32>
    tpu.vector_store %arg7[%c0_20, %c0_21], %30 {strides = array<i32>} : memref<4x256xf32, #tpu.memory_space<vmem>>, vector<4x256xf32>,
    return
  }
  func.func @transform_0(%arg0: i32) -> (i32, i32) {
    %c0_i32 = arith.constant 0 : i32
    %c0_i32_0 = arith.constant 0 : i32
    return %arg0, %c0_i32 : i32, i32
  }
  func.func @transform_1(%arg0: i32) -> (i32, i32) {
    %c0_i32 = arith.constant 0 : i32
    %c0_i32_0 = arith.constant 0 : i32
    %c0_i32_1 = arith.constant 0 : i32
    return %c0_i32, %c0_i32_0 : i32, i32
  }
  func.func @transform_2(%arg0: i32) -> (i32, i32) {
    %c0_i32 = arith.constant 0 : i32
    %c0_i32_0 = arith.constant 0 : i32
    %c0_i32_1 = arith.constant 0 : i32
    return %c0_i32, %c0_i32_0 : i32, i32
  }
  func.func @transform_3(%arg0: i32) -> (i32, i32) {
    %c0_i32 = arith.constant 0 : i32
    %c0_i32_0 = arith.constant 0 : i32
    %c0_i32_1 = arith.constant 0 : i32
    return %c0_i32, %c0_i32_0 : i32, i32
  }
  func.func @transform_4(%arg0: i32) -> (i32, i32) {
    %c0_i32 = arith.constant 0 : i32
    %c0_i32_0 = arith.constant 0 : i32
    %c0_i32_1 = arith.constant 0 : i32
    return %c0_i32, %c0_i32_0 : i32, i32
  }
  func.func @transform_5(%arg0: i32) -> (i32, i32) {
    %c0_i32 = arith.constant 0 : i32
    %c0_i32_0 = arith.constant 0 : i32
    %c0_i32_1 = arith.constant 0 : i32
    return %c0_i32, %c0_i32_0 : i32, i32
  }
  func.func @transform_6(%arg0: i32) -> (i32, i32) {
    %c0_i32 = arith.constant 0 : i32
    %c0_i32_0 = arith.constant 0 : i32
    return %c0_i32, %arg0 : i32, i32
  }
}

</mosaic_0001>

<bundles_post_ra>
// kernel: tpu_custom_call.1
= control target key start
LH: loop header
LB: loop body
LE: loop exit
PB: predicated region body
PF: predicated region fallthrough
CT: control target
= control target key end

     0   :  { %vm143_vm0 = vcmask 64512   ;;  %s908_s0 = inlined_call_operand.vmem [shape: f32[256,8], index: 0, kind: input, shape index: {}]   ;;  %s909_s1 = inlined_call_operand.vmem [shape: f32[16,8], index: 1, kind: input, shape index: {}]   ;;  %s910_s2 = inlined_call_operand.vmem [shape: f32[64,16], index: 2, kind: input, shape index: {}]   ;;  %s911_s3 = inlined_call_operand.vmem [shape: f32[16,64], index: 3, kind: input, shape index: {}]   ;;  %s912_s4 = inlined_call_operand.vmem [shape: f32[4,16], index: 4, kind: input, shape index: {}]   ;;  %s913_s5 = inlined_call_operand.vmem [shape: f32[64,4], index: 5, kind: input, shape index: {}]   ;;  %s914_s6 = inlined_call_operand.hbm [shape: f32[4,256], index: 6, kind: output, shape index: {}]  }
   0x1   :  { %v126_v0 = vld [vmem:[%s908_s0 + $0x78] sm:$0xff]  ;;  %v125_v2 = vld [vmem:[%s908_s0 + $0x70] sm:$0xff]  ;;  %v124_v4 = vld [vmem:[%s908_s0 + $0x68] sm:$0xff] }
   0x2   :  { %v142_v1 = vld [vmem:[%s908_s0 + $0xf8] sm:$0xff]  ;;  %542 = vmatpush.xpose.msk.msra.mxu0 %vm143_vm0, %v126_v0  ;;  %v141_v3 = vld [vmem:[%s908_s0 + $0xf0] sm:$0xff]  ;;  %v140_v5 = vld [vmem:[%s908_s0 + $0xe8] sm:$0xff] }
   0x3   :  { %560 = vmatpush.xpose.msk.msra.mxu1 %vm143_vm0, %v142_v1 }
   0x6   :  { %543 = vmatpush.xpose.msk.msra.mxu0 %vm143_vm0, %v125_v2 }
   0x7   :  { %561 = vmatpush.xpose.msk.msra.mxu1 %vm143_vm0, %v141_v3 }
   0x8   :  { %11 = vsyncpa [#allocation3], 0  ;;  %v123_v6 = vld [vmem:[%s908_s0 + $0x60] sm:$0xff]  ;;  %v122_v8 = vld [vmem:[%s908_s0 + $0x58] sm:$0xff]  ;;  %v639_v21 = vmov 0   ;;  %v640_v37 = vmov 1  }
   0x9   :  { %v139_v7 = vld [vmem:[%s908_s0 + $0xe0] sm:$0xff]  ;;  %v138_v9 = vld [vmem:[%s908_s0 + $0xd8] sm:$0xff]  ;;  %v121_v10 = vld [vmem:[%s908_s0 + $0x50] sm:$0xff]  ;;  %605 = vset.pattern.permute.xlu0 %v639_v21  ;;  %606 = vset.pattern.permute.xlu1 %v640_v37  ;;  %vm296_vm1 = vcmask 130048   ;;  %vm419_vm2 = vcmask 523264   ;;  %s643_s26 = smov [#allocation2]  }
   0xa   :  { %544 = vmatpush.xpose.msk.msra.mxu0 %vm143_vm0, %v124_v4  ;;  %v137_v11 = vld [vmem:[%s908_s0 + $0xd0] sm:$0xff]  ;;  %v120_v12 = vld [vmem:[%s908_s0 + $0x48] sm:$0xff]  ;;  %v119_v14 = vld [vmem:[%s908_s0 + $0x40] sm:$0xff]  ;;  %607 = vset.pattern.permute.xlu2 %v640_v37  ;;  %s531_s27 = sshll.u32 %s643_s26, 4  ;;  %s533_s30 = sshll.u32 %s914_s6, 4  ;;  %vm522_vm3 = vcmask 1043456   ;;  %s532_s27 = int_to_ptr.vmem [resolvable:$true] %s531_s27  ;;  %s534_s30 = int_to_ptr.hbm [resolvable:$true] %s533_s30 }
   0xb   :  { %562 = vmatpush.xpose.msk.msra.mxu1 %vm143_vm0, %v140_v5  ;;  %v136_v13 = vld [vmem:[%s908_s0 + $0xc8] sm:$0xff]  ;;  %v135_v15 = vld [vmem:[%s908_s0 + $0xc0] sm:$0xff]  ;;  %v118_v16 = vld [vmem:[%s908_s0 + $0x38] sm:$0xff] }
   0xc   :  { %v134_v17 = vld [vmem:[%s908_s0 + $0xb8] sm:$0xff]  ;;  %v752_v18 = vld [vmem:[%s913_s5 + $0x8] sm:$0xff]  ;;  %v117_v19 = vld [vmem:[%s908_s0 + $0x30] sm:$0xff] }
   0xd   :  { %v133_v20 = vld [vmem:[%s908_s0 + $0xb0] sm:$0xff]  ;;  %46 = vperm.xlu0 %605, %v752_v18   ;;  %v116_v22 = vld [vmem:[%s908_s0 + $0x28] sm:$0xff]  ;;  %v774_v24 = vld [vmem:[%s913_s5] sm:$0xff] }
   0xe   :  { %545 = vmatpush.xpose.msk.msra.mxu0 %vm143_vm0, %v123_v6  ;;  %v132_v23 = vld [vmem:[%s908_s0 + $0xa8] sm:$0xff]  ;;  %v115_v25 = vld [vmem:[%s908_s0 + $0x20] sm:$0xff]  ;;  %v114_v27 = vld [vmem:[%s908_s0 + $0x18] sm:$0xff] }
   0xf   :  { %563 = vmatpush.xpose.msk.msra.mxu1 %vm143_vm0, %v139_v7  ;;  %v131_v26 = vld [vmem:[%s908_s0 + $0xa0] sm:$0xff]  ;;  %v130_v28 = vld [vmem:[%s908_s0 + $0x98] sm:$0xff]  ;;  %v113_v29 = vld [vmem:[%s908_s0 + $0x10] sm:$0xff] }
  0x10   :  { %v129_v30 = vld [vmem:[%s908_s0 + $0x90] sm:$0xff]  ;;  %v112_v31 = vld [vmem:[%s908_s0 + $0x8] sm:$0xff]  ;;  %v111_v33 = vld [vmem:[%s908_s0] sm:$0xff] }
  0x11   :  { %v128_v32 = vld [vmem:[%s908_s0 + $0x88] sm:$0xff]  ;;  %v127_v34 = vld [vmem:[%s908_s0 + $0x80] sm:$0xff]  ;;  %v56_v38 = vld [vmem:[%s913_s5 + $0x38] sm:$0xff] }
  0x12   :  { %546 = vmatpush.xpose.msk.msra.mxu0 %vm143_vm0, %v122_v8  ;;  %v24_v35 = vld [vmem:[%s909_s1] sm:$0xff]  ;;  %v25_v36 = vld [vmem:[%s909_s1 + $0x8] sm:$0xff]  ;;  %94 = vperm.xlu1 %606, %v56_v38   ;;  %v55_v39 = vld [vmem:[%s913_s5 + $0x30] sm:$0xff] }
  0x13   :  { %564 = vmatpush.xpose.msk.msra.mxu1 %vm143_vm0, %v138_v9  ;;  %v51_v40 = vld [vmem:[%s913_s5 + $0x10] sm:$0xff]  ;;  %v26_v55 = vld [vmem:[%s910_s2] sm:$0xff]  ;;  %v54_v56 = vld [vmem:[%s913_s5 + $0x28] sm:$0xff] }
  0x14   :  { %84 = vperm.xlu2 %607, %v54_v56   ;;  %v27_v57 = vld [vmem:[%s910_s2 + $0x8] sm:$0xff]  ;;  %v53_v58 = vld [vmem:[%s913_s5 + $0x20] sm:$0xff]  ;;  %v52_v59 = vld [vmem:[%s913_s5 + $0x18] sm:$0xff] }
  0x15   :  { %41 = vperm.xlu0 %605, %v774_v24   ;;  %v28_v60 = vld [vmem:[%s910_s2 + $0x10] sm:$0xff]  ;;  %v29_v61 = vld [vmem:[%s910_s2 + $0x18] sm:$0xff]  ;;  %v30_v62 = vld [vmem:[%s910_s2 + $0x20] sm:$0xff] }
  0x16   :  { %547 = vmatpush.xpose.msk.msra.mxu0 %vm143_vm0, %v121_v10  ;;  %v31_v63 = vld [vmem:[%s910_s2 + $0x28] sm:$0xff]  ;;  %v32_v0 = vld [vmem:[%s910_s2 + $0x30] sm:$0xff]  ;;  %v33_v1 = vld [vmem:[%s910_s2 + $0x38] sm:$0xff] }
  0x17   :  { %565 = vmatpush.xpose.msk.msra.mxu1 %vm143_vm0, %v137_v11 }
  0x1a   :  { %548 = vmatpush.xpose.msk.msra.mxu0 %vm143_vm0, %v120_v12  ;;  %89 = vperm.xlu1 %606, %v55_v39  }
  0x1b   :  { %566 = vmatpush.xpose.msk.msra.mxu1 %vm143_vm0, %v136_v13 }
  0x1c   :  { %79 = vperm.xlu2 %607, %v53_v58  }
  0x1d   :  { %608 = vset.pattern.permute.xlu0 %v640_v37 }
  0x1e   :  { %549 = vmatpush.xpose.msk.msra.mxu0 %vm143_vm0, %v119_v14  ;;  %74 = vperm.xlu0 %608, %v52_v59   ;;  %v34_v59 = vld [vmem:[%s911_s3] sm:$0xff] }
  0x1f   :  { %567 = vmatpush.xpose.msk.msra.mxu1 %vm143_vm0, %v135_v15 }
  0x22   :  { %550 = vmatpush.xpose.msk.msra.mxu0 %vm143_vm0, %v118_v16  ;;  %69 = vperm.xlu1 %606, %v51_v40  }
  0x23   :  { %568 = vmatpush.xpose.msk.msra.mxu1 %vm143_vm0, %v134_v17 }
  0x24   :  { %64 = vperm.xlu2 %607, %v752_v18  }
  0x26   :  { %551 = vmatpush.xpose.msk.msra.mxu0 %vm143_vm0, %v117_v19 }
  0x27   :  { %569 = vmatpush.xpose.msk.msra.mxu1 %vm143_vm0, %v133_v20  ;;  %v641_v20 = vmov 2  }
  0x28   :  { %610 = vset.pattern.permute.xlu0 %v641_v20 }
  0x29   :  { %98 = vperm.xlu0 %610, %v774_v24  }
  0x2a   :  { %552 = vmatpush.xpose.msk.msra.mxu0 %vm143_vm0, %v116_v22  ;;  %59 = vperm.xlu1 %606, %v774_v24  }
  0x2b   :  { %570 = vmatpush.xpose.msk.msra.mxu1 %vm143_vm0, %v132_v23 }
  0x2c   :  { %609 = vset.pattern.permute.xlu2 %v641_v20 }
  0x2d   :  { %102 = vperm.xlu2 %609, %v752_v18  }
  0x2e   :  { %553 = vmatpush.xpose.msk.msra.mxu0 %vm143_vm0, %v115_v25 }
  0x2f   :  { %571 = vmatpush.xpose.msk.msra.mxu1 %vm143_vm0, %v131_v26 }
  0x32   :  { %554 = vmatpush.xpose.msk.msra.mxu0 %vm143_vm0, %v114_v27 }
  0x33   :  { %572 = vmatpush.xpose.msk.msra.mxu1 %vm143_vm0, %v130_v28 }
  0x36   :  { %555 = vmatpush.xpose.msk.msra.mxu0 %vm143_vm0, %v113_v29 }
  0x37   :  { %573 = vmatpush.xpose.msk.msra.mxu1 %vm143_vm0, %v129_v30 }
  0x3a   :  { %556 = vmatpush.xpose.msk.msra.mxu0 %vm143_vm0, %v112_v31 }
  0x3b   :  { %574 = vmatpush.xpose.msk.msra.mxu1 %vm143_vm0, %v128_v32 }
  0x3e   :  { %557 = vmatpush.xpose.msk.msra.mxu0 %vm143_vm0, %v111_v33 }
  0x3f   :  { %575 = vmatpush.xpose.msk.msra.mxu1 %vm143_vm0, %v127_v34 }
  0x41   :  { %558 = vmatmul.msk.f32.vlgmr.msra.gmra.mxu0 %vm143_vm0, %v24_v35 }
  0x42   :  { %576 = vmatmul.msk.f32.vlgmr.msra.gmra.mxu1 %vm143_vm0, %v24_v35 }
  0x49   :  { %559 = vmatmul.msk.f32.gmra.mxu0 %vm143_vm0, %v25_v36 }
  0x4a   :  { %577 = vmatmul.msk.f32.gmra.mxu1 %vm143_vm0, %v25_v36 }
  0x6e   :  { %v85_v15 = vpop.permute.xlu2 %84 }
  0x76   :  { %v80_v21 = vpop.permute.xlu2 %79 }
  0x7f   :  { %v47_v41 = vpop.permute.xlu0 %46 }
  0x84   :  { %v95_v12 = vpop.permute.xlu1 %94 }
  0x87   :  { %v42_v44 = vpop.permute.xlu0 %41 }
  0x8c   :  { %v90_v16 = vpop.permute.xlu1 %89 }
  0x90   :  { %v75_v34 = vpop.permute.xlu0 %74 }
  0x94   :  { %v70_v22 = vpop.permute.xlu1 %69 }
  0xbe   :  { %v263_v42 = vpop.f32.mrf.mxu0 }
  0xbf   :  { %v286_v43 = vpop.f32.mrf.mxu1  ;;  %v264_v47 = vadd.f32 %v263_v42, %v42_v44 }
  0xc0   :  { %v287_v48 = vadd.f32 %v286_v43, %v42_v44 }
  0xc1   :  { %v292_v53 = vmax.f32 %v264_v47, 0.0 }
  0xc2   :  { %v293_v54 = vmax.f32 %v287_v48, 0.0 }
  0xc6   :  { %v266_v45 = vpop.f32.mrf.mxu0 }
  0xc7   :  { %v289_v46 = vpop.f32.mrf.mxu1  ;;  %v267_v49 = vadd.f32 %v266_v45, %v47_v41 }
  0xc8   :  { %v290_v50 = vadd.f32 %v289_v46, %v47_v41  ;;  %v65_v41 = vpop.permute.xlu2 %64  ;;  %v60_v46 = vpop.permute.xlu1 %59 }
  0xc9   :  { %v294_v51 = vmax.f32 %v267_v49, 0.0 }
  0xca   :  { %v295_v52 = vmax.f32 %v290_v50, 0.0 }
  0xcb   :  { %335 = vmatpush.msra.mxu2 %v294_v51 }
  0xcc   :  { %376 = vmatpush.msra.mxu3 %v295_v52 }
  0xcd   :  { %336 = vmatpush.msra.mxu2 %v292_v53 }
  0xce   :  { %377 = vmatpush.msra.mxu3 %v293_v54  ;;  %578 = vmatmul.msk.f32.vlgmr.msra.gmra.mxu2 %vm296_vm1, %v26_v55 }
  0xcf   :  { %586 = vmatmul.msk.f32.vlgmr.msra.gmra.mxu3 %vm296_vm1, %v26_v55 }
  0xd6   :  { %579 = vmatmul.msk.f32.gmra.mxu2 %vm296_vm1, %v27_v57 }
  0xd7   :  { %587 = vmatmul.msk.f32.gmra.mxu3 %vm296_vm1, %v27_v57 }
  0xde   :  { %580 = vmatmul.msk.f32.gmra.mxu2 %vm296_vm1, %v28_v60 }
  0xdf   :  { %588 = vmatmul.msk.f32.gmra.mxu3 %vm296_vm1, %v28_v60  ;;  %v35_v60 = vld [vmem:[%s911_s3 + $0x8] sm:$0xff] }
  0xe6   :  { %581 = vmatmul.msk.f32.gmra.mxu2 %vm296_vm1, %v29_v61 }
  0xe7   :  { %589 = vmatmul.msk.f32.gmra.mxu3 %vm296_vm1, %v29_v61  ;;  %v105_v61 = vld [vmem:[%s913_s5] sm:$0xf] }
  0xee   :  { %582 = vmatmul.msk.f32.gmra.mxu2 %vm296_vm1, %v30_v62 }
  0xef   :  { %590 = vmatmul.msk.f32.gmra.mxu3 %vm296_vm1, %v30_v62  ;;  %v642_v62 = vmov 3  }
  0xf0   :  { %611 = vset.pattern.permute.xlu1 %v642_v62  ;;  %612 = vset.pattern.permute.xlu0 %v642_v62 }
  0xf1   :  { %108 = vperm.xlu1 %611, %v105_v61  }
  0xf6   :  { %583 = vmatmul.msk.f32.gmra.mxu2 %vm296_vm1, %v31_v63 }
  0xf7   :  { %591 = vmatmul.msk.f32.gmra.mxu3 %vm296_vm1, %v31_v63 }
  0xfe   :  { %584 = vmatmul.msk.f32.gmra.mxu2 %vm296_vm1, %v32_v0 }
  0xff   :  { %592 = vmatmul.msk.f32.gmra.mxu3 %vm296_vm1, %v32_v0 }
 0x106   :  { %585 = vmatmul.msk.f32.gmra.mxu2 %vm296_vm1, %v33_v1 }
 0x107   :  { %593 = vmatmul.msk.f32.gmra.mxu3 %vm296_vm1, %v33_v1  ;;  %v103_v1 = vpop.permute.xlu2 %102 }
 0x151   :  { %v338_v2 = vpop.f32.mrf.mxu2 }
 0x152   :  { %v379_v3 = vpop.f32.mrf.mxu3  ;;  %v339_v51 = vadd.f32 %v338_v2, %v60_v46  ;;  %v99_v2 = vpop.permute.xlu0 %98 }
 0x153   :  { %v380_v52 = vadd.f32 %v379_v3, %v60_v46 }
 0x154   :  { %v403_v57 = vmax.f32 %v339_v51, 0.0 }
 0x155   :  { %v404_v58 = vmax.f32 %v380_v52, 0.0 }
 0x159   :  { %v341_v4 = vpop.f32.mrf.mxu2 }
 0x15a   :  { %v382_v5 = vpop.f32.mrf.mxu3  ;;  %v342_v47 = vadd.f32 %v341_v4, %v65_v41 }
 0x15b   :  { %v383_v48 = vadd.f32 %v382_v5, %v65_v41 }
 0x15c   :  { %v405_v55 = vmax.f32 %v342_v47, 0.0 }
 0x15d   :  { %v406_v56 = vmax.f32 %v383_v48, 0.0 }
 0x161   :  { %v344_v6 = vpop.f32.mrf.mxu2 }
 0x162   :  { %v385_v7 = vpop.f32.mrf.mxu3  ;;  %v345_v42 = vadd.f32 %v344_v6, %v70_v22 }
 0x163   :  { %v386_v43 = vadd.f32 %v385_v7, %v70_v22 }
 0x164   :  { %v407_v53 = vmax.f32 %v345_v42, 0.0 }
 0x165   :  { %v408_v54 = vmax.f32 %v386_v43, 0.0 }
 0x169   :  { %v347_v8 = vpop.f32.mrf.mxu2 }
 0x16a   :  { %v388_v9 = vpop.f32.mrf.mxu3  ;;  %v348_v24 = vadd.f32 %v347_v8, %v75_v34 }
 0x16b   :  { %v389_v18 = vadd.f32 %v388_v9, %v75_v34 }
 0x16c   :  { %v409_v49 = vmax.f32 %v348_v24, 0.0 }
 0x16d   :  { %v410_v50 = vmax.f32 %v389_v18, 0.0 }
 0x171   :  { %v350_v10 = vpop.f32.mrf.mxu2 }
 0x172   :  { %v391_v11 = vpop.f32.mrf.mxu3  ;;  %v351_v35 = vadd.f32 %v350_v10, %v80_v21 }
 0x173   :  { %v392_v36 = vadd.f32 %v391_v11, %v80_v21 }
 0x174   :  { %v411_v44 = vmax.f32 %v351_v35, 0.0 }
 0x175   :  { %v412_v45 = vmax.f32 %v392_v36, 0.0 }
 0x179   :  { %v353_v13 = vpop.f32.mrf.mxu2 }
 0x17a   :  { %v394_v14 = vpop.f32.mrf.mxu3  ;;  %v354_v30 = vadd.f32 %v353_v13, %v85_v15  ;;  %v36_v13 = vld [vmem:[%s912_s4] sm:$0xf] }
 0x17b   :  { %v395_v31 = vadd.f32 %v394_v14, %v85_v15  ;;  %v109_v14 = vpop.permute.xlu1 %108 }
 0x17c   :  { %v413_v39 = vmax.f32 %v354_v30, 0.0 }
 0x17d   :  { %v414_v40 = vmax.f32 %v395_v31, 0.0 }
 0x181   :  { %v356_v17 = vpop.f32.mrf.mxu2 }
 0x182   :  { %v397_v19 = vpop.f32.mrf.mxu3  ;;  %v357_v26 = vadd.f32 %v356_v17, %v90_v16 }
 0x183   :  { %v398_v27 = vadd.f32 %v397_v19, %v90_v16 }
 0x184   :  { %v415_v37 = vmax.f32 %v357_v26, 0.0 }
 0x185   :  { %v416_v38 = vmax.f32 %v398_v27, 0.0 }
 0x189   :  { %v359_v23 = vpop.f32.mrf.mxu2 }
 0x18a   :  { %v400_v25 = vpop.f32.mrf.mxu3  ;;  %v360_v28 = vadd.f32 %v359_v23, %v95_v12 }
 0x18b   :  { %v401_v29 = vadd.f32 %v400_v25, %v95_v12 }
 0x18c   :  { %v417_v32 = vmax.f32 %v360_v28, 0.0 }
 0x18d   :  { %v418_v33 = vmax.f32 %v401_v29, 0.0 }
 0x18e   :  { %434 = vmatpush.msrb.mxu2 %v417_v32 }
 0x18f   :  { %457 = vmatpush.msrb.mxu3 %v418_v33 }
 0x190   :  { %435 = vmatpush.msrb.mxu2 %v415_v37 }
 0x191   :  { %458 = vmatpush.msrb.mxu3 %v416_v38 }
 0x192   :  { %436 = vmatpush.msrb.mxu2 %v413_v39 }
 0x193   :  { %459 = vmatpush.msrb.mxu3 %v414_v40 }
 0x194   :  { %437 = vmatpush.msrb.mxu2 %v411_v44 }
 0x195   :  { %460 = vmatpush.msrb.mxu3 %v412_v45 }
 0x196   :  { %438 = vmatpush.msrb.mxu2 %v409_v49 }
 0x197   :  { %461 = vmatpush.msrb.mxu3 %v410_v50 }
 0x198   :  { %439 = vmatpush.msrb.mxu2 %v407_v53 }
 0x199   :  { %462 = vmatpush.msrb.mxu3 %v408_v54 }
 0x19a   :  { %440 = vmatpush.msrb.mxu2 %v405_v55 }
 0x19b   :  { %463 = vmatpush.msrb.mxu3 %v406_v56 }
 0x19c   :  { %441 = vmatpush.msrb.mxu2 %v403_v57 }
 0x19d   :  { %464 = vmatpush.msrb.mxu3 %v404_v58  ;;  %594 = vmatmul.msk.f32.vlgmr.msrb.gmra.mxu2 %vm419_vm2, %v34_v59 }
 0x19e   :  { %596 = vmatmul.msk.f32.vlgmr.msrb.gmra.mxu3 %vm419_vm2, %v34_v59 }
 0x1a5   :  { %595 = vmatmul.msk.f32.gmra.mxu2 %vm419_vm2, %v35_v60 }
 0x1a6   :  { %597 = vmatmul.msk.f32.gmra.mxu3 %vm419_vm2, %v35_v60 }
 0x220   :  { %v443_v0 = vpop.f32.mrf.mxu2 }
 0x221   :  { %v466_v63 = vpop.f32.mrf.mxu3  ;;  %v444_v6 = vadd.f32 %v443_v0, %v99_v2 }
 0x222   :  { %v467_v7 = vadd.f32 %v466_v63, %v99_v2 }
 0x223   :  { %v472_v11 = vmax.f32 %v444_v6, 0.0 }
 0x224   :  { %v473_v12 = vmax.f32 %v467_v7, 0.0 }
 0x228   :  { %v446_v4 = vpop.f32.mrf.mxu2 }
 0x229   :  { %v469_v3 = vpop.f32.mrf.mxu3  ;;  %v447_v8 = vadd.f32 %v446_v4, %v103_v1 }
 0x22a   :  { %v470_v5 = vadd.f32 %v469_v3, %v103_v1 }
 0x22b   :  { %v474_v10 = vmax.f32 %v447_v8, 0.0 }
 0x22c   :  { %v475_v9 = vmax.f32 %v470_v5, 0.0 }
 0x22d   :  { %493 = vmatpush.msrb.mxu0 %v474_v10 }
 0x22e   :  { %513 = vmatpush.msrb.mxu1 %v475_v9 }
 0x22f   :  { %494 = vmatpush.msrb.mxu0 %v472_v11 }
 0x230   :  { %514 = vmatpush.msrb.mxu1 %v473_v12  ;;  %598 = vmatmul.msk.f32.vlgmr.msrb.gmra.mxu0 %vm296_vm1, %v36_v13 }
 0x231   :  { %599 = vmatmul.msk.f32.vlgmr.msrb.gmra.mxu1 %vm296_vm1, %v36_v13 }
 0x2ad   :  { %v496_v16 = vpop.f32.mrf.mxu0 }
 0x2ae   :  { %v516_v15 = vpop.f32.mrf.mxu1  ;;  %v497_v20 = vadd.f32 %v496_v16, %v109_v14 }
 0x2af   :  { %v517_v17 = vadd.f32 %v516_v15, %v109_v14 }
 0x2b1   :  { %v521_v19 = vrot.slane %v517_v17, 4 }
 0x2b3   :  { %v523_v21 = vsel %vm522_vm3, %v497_v20, %v521_v19 }
 0x2b4   :  { %525 = vst [vmem:[#allocation2] sm:$0xff] %v523_v21 }
 0x2b5   :  { %536 = dma.vmem_to_hbm [thread:$0]  %s532_s27, 128, %s534_s30, [#allocation3]  }
 0x2b6   :  { %637 = dma.done.wait [#allocation3], 128  }
 0x2b7   :  { %638 = vsyncadd [#allocation3], 4294967168 }
 0x2b8   :  { %541 = vsyncpa [#allocation3], 1 }

</bundles_post_ra>
